<compile_context>
chip_gen: v5e
topology: v5e:2x2
jax: 0.10.0
libtpu: 0.0.40
codegen_flags: <defaults>
</compile_context>

<pallas_src>
import jax
import jax.numpy as jnp
from jax import lax
from jax.experimental import pallas as pl
from jax.experimental.pallas import tpu as pltpu

_LANES = 128
_SUBLANES = 8


def _round_up(x, m):
    return (x + m - 1) // m * m


def _vmem_capacity_bytes():
    try:
        info = pltpu.get_tpu_info()
        cap = getattr(info, "vmem_capacity_bytes", None)
        if cap:
            return int(cap)
    except Exception:
        pass
    return 64 * 1024 * 1024  # conservative (v7x per-TensorCore VMEM)


def _make_kernel(*, ts, hw, nk, acc_lanes):
    """Build the kernel; ts/hw/nk/acc_lanes are static Python ints."""
    last_valid = hw - (nk - 1) * ts          # valid elems in the last spatial tile
    nchunks = ts // _LANES if acc_lanes == _LANES else 1

    def _partial(x):
        # x: (Nb, C, ts) f32  ->  partial spatial sum (layout-preserving).
        if acc_lanes == _LANES:
            # Elementwise vreg adds over 128-lane chunks; the cross-lane (XLU)
            # reduce is deferred to the epilogue.
            s = x[:, :, 0:_LANES]
            for j in range(1, nchunks):
                s = s + x[:, :, j * _LANES:(j + 1) * _LANES]
            return s                          # (Nb, C, 128)
        return jnp.sum(x, axis=-1)            # (Nb, C)

    def kernel(x_ref, w_ref, b_ref, o_ref, acc_ref):
        # x_ref: (Nb, C, ts) spatial tile (native dtype)
        # w_ref: (C, K_pad)  classifier weight^T, pre-scaled by 1/(H*W), f32
        # b_ref: (1, K_pad)  bias, f32
        # o_ref: (Nb, K_pad) f32 logits tile
        # acc_ref: (Nb, C[, 128]) f32 partial sums, resident across the k axis
        k = pl.program_id(1)

        @pl.when(k == 0)
        def _():
            acc_ref[...] = jnp.zeros_like(acc_ref)

        @pl.when(k < nk - 1)
        def _():
            acc_ref[...] += _partial(x_ref[...].astype(jnp.float32))

        @pl.when(k == nk - 1)
        def _():
            x = x_ref[...].astype(jnp.float32)
            if last_valid < ts:  # static: mask the ragged last spatial tile
                idx = lax.broadcasted_iota(jnp.int32, x.shape, 2)
                x = jnp.where(idx < last_valid, x, 0.0)
            acc = acc_ref[...] + _partial(x)
            pooled = jnp.sum(acc, axis=-1) if acc_lanes == _LANES else acc
            # avgpool scale is folded into w_ref, so sum @ w == mean @ W^T.
            logits = jnp.dot(pooled, w_ref[...],
                             preferred_element_type=jnp.float32)
            o_ref[...] = logits + b_ref[...]

    return kernel


def model_part_forward(x_nchw, weight, bias):
    """x_nchw: (N, C, H, W); weight: (num_classes, C) torch layout; bias: (num_classes,)."""
    N, C, H, W = x_nchw.shape
    num_classes = weight.shape[0]
    HW = H * W
    itemsize = jnp.dtype(x_nchw.dtype).itemsize

    K_pad = _round_up(max(num_classes, 1), _LANES)      # lane-dense output
    vmem_cap = _vmem_capacity_bytes()
    budget = max(vmem_cap // 8, 4 << 20)                # bytes per streamed x buffer

    # ---- batch tile ---------------------------------------------------------
    if N <= _SUBLANES:
        Nb = N                                          # full-dim block (always legal)
    else:
        # Multiple of 8, <= ~half the batch (>=2 steps on the parallel axis),
        # shrunk first when C is large so a 128-wide spatial tile still fits.
        nb_cap = max(_SUBLANES,
                     (budget // max(1, C * _LANES * itemsize))
                     // _SUBLANES * _SUBLANES)
        Nb = max(_SUBLANES, min(_round_up(pl.cdiv(N, 2), _SUBLANES), nb_cap))

    # ---- spatial tile -------------------------------------------------------
    ts_cap = budget // max(1, Nb * C * itemsize)
    if ts_cap >= HW or HW <= _LANES:
        TS, nk = HW, 1                                  # single full-extent tile
    else:
        TS = min(max(_LANES, ts_cap // _LANES * _LANES), 256 * _LANES)
        nk = pl.cdiv(HW, TS)

    # Deferred lane-reduce only when spatial is tiled and the wide accumulator
    # stays cheap.
    acc_lanes = _LANES if (nk > 1 and Nb * C * _LANES * 4 <= vmem_cap // 8) else 1
    acc_shape = (Nb, C, _LANES) if acc_lanes == _LANES else (Nb, C)

    # ---- tiny wrapper-side plumbing (weights/bias only; no activation copy) --
    x_flat = x_nchw.reshape(N, C, HW)                   # layout-preserving view
    w_t = weight.T.astype(jnp.float32) / float(HW)      # fold 1/(H*W) once
    w_pad = jnp.pad(w_t, ((0, 0), (0, K_pad - num_classes)))
    b_pad = jnp.pad(bias.astype(jnp.float32).reshape(1, num_classes),
                    ((0, 0), (0, K_pad - num_classes)))

    grid = (pl.cdiv(N, Nb), nk)

    vmem_need = (2 * Nb * C * TS * itemsize              # double-buffered x tiles
                 + 2 * C * K_pad * 4                     # weight buffers
                 + 2 * _SUBLANES * K_pad * 4             # bias buffers
                 + 2 * max(Nb, _SUBLANES) * K_pad * 4    # output buffers
                 + Nb * C * acc_lanes * 4)               # accumulator scratch
    vmem_limit = int(min(vmem_cap, max(2 * vmem_need, 16 << 20)))

    cost = pl.CostEstimate(
        flops=N * C * HW + 2 * N * C * num_classes,
        transcendentals=0,
        bytes_accessed=(N * C * HW * itemsize
                        + C * K_pad * 4 + K_pad * 4 + N * K_pad * 4),
    )

    kernel = _make_kernel(ts=TS, hw=HW, nk=nk, acc_lanes=acc_lanes)

    out_pad = pl.pallas_call(
        kernel,
        out_shape=jax.ShapeDtypeStruct((N, K_pad), jnp.float32),
        grid_spec=pltpu.PrefetchScalarGridSpec(
            num_scalar_prefetch=0,
            grid=grid,
            in_specs=[
                pl.BlockSpec((Nb, C, TS), lambda i, k: (i, 0, k)),
                pl.BlockSpec((C, K_pad), lambda i, k: (0, 0)),
                pl.BlockSpec((1, K_pad), lambda i, k: (0, 0)),
            ],
            out_specs=pl.BlockSpec((Nb, K_pad), lambda i, k: (i, 0)),
            scratch_shapes=[pltpu.VMEM(acc_shape, jnp.float32)],
        ),
        compiler_params=pltpu.CompilerParams(
            dimension_semantics=("parallel", "arbitrary"),
            vmem_limit_bytes=vmem_limit,
        ),
        cost_estimate=cost,
    )(x_flat, w_pad, b_pad)

    # Strip class padding (no batch padding was introduced); logits are f32.
    return out_pad[:, :num_classes]


if __name__ == "__main__":
    # Small shapes consistent with the module: NCHW feature map -> avgpool ->
    # flatten -> linear classifier (torch Linear layout: (out, in)).
    N, C, H, W = 2, 32, 16, 16
    NUM_CLASSES = 10

    key = jax.random.PRNGKey(0)
    kx, kw, kb = jax.random.split(key, 3)

    x = jax.random.normal(kx, (N, C, H, W), dtype=jnp.float32)
    weight = jax.random.normal(kw, (NUM_CLASSES, C), dtype=jnp.float32) * 0.05
    bias = jax.random.normal(kb, (NUM_CLASSES,), dtype=jnp.float32) * 0.01

    out = model_part_forward(x, weight, bias)
    out = jax.block_until_ready(out)

    # Pure-JAX reference.
    ref = jnp.mean(x, axis=(2, 3)) @ weight.T + bias
    assert out.shape == (N, NUM_CLASSES)
    assert jnp.allclose(out, ref, atol=1e-4, rtol=1e-4), "mismatch vs reference"

    print("KERNEL_OK")
</pallas_src>

<mosaic_0001>
module attributes {stable_mosaic.version = 11 : i64} {
  func.func @kernel(%arg0: i32, %arg1: i32, %arg2: memref<2x32x256xf32, #tpu.memory_space<vmem>>, %arg3: memref<32x128xf32, #tpu.memory_space<vmem>>, %arg4: memref<1x128xf32, #tpu.memory_space<vmem>>, %arg5: memref<2x128xf32, #tpu.memory_space<vmem>>, %arg6: memref<2x32xf32, #tpu.memory_space<vmem>>) attributes {dimension_semantics = [#tpu.dimension_semantics<parallel>, #tpu.dimension_semantics<arbitrary>], iteration_bounds = array<i64: 1, 1>, scalar_prefetch = 0 : i64, scratch_operands = 1 : i64, tpu.core_type = #tpu.core_type<tc>, window_params = [{transform_indices = @transform_0, window_bounds = array<i64: 2, 32, 256>}, {pipeline_mode = #tpu.pipeline_mode<synchronous>, transform_indices = @transform_1, window_bounds = array<i64: 32, 128>}, {pipeline_mode = #tpu.pipeline_mode<synchronous>, transform_indices = @transform_2, window_bounds = array<i64: 1, 128>}, {transform_indices = @transform_3, window_bounds = array<i64: 2, 128>}]} {
    %c0_i32 = arith.constant 0 : i32
    %0 = arith.cmpi eq, %arg1, %c0_i32 : i32
    %1 = arith.extui %0 : i1 to i32
    %c0_i32_0 = arith.constant 0 : i32
    %2 = arith.cmpi ne, %1, %c0_i32_0 : i32
    scf.if %2 {
      %cst = arith.constant 0.000000e+00 : f32
      %9 = vector.broadcast %cst : f32 to vector<2x32xf32>
      %c0 = arith.constant 0 : index
      %c0_5 = arith.constant 0 : index
      %10 = vector.load %arg6[%c0, %c0_5] : memref<2x32xf32, #tpu.memory_space<vmem>>, vector<2x32xf32>
      tpu.vector_store %arg6[%c0, %c0_5], %9 {strides = array<i32>} : memref<2x32xf32, #tpu.memory_space<vmem>>, vector<2x32xf32>,
    } else {
    }
    %c0_i32_1 = arith.constant 0 : i32
    %3 = arith.cmpi slt, %arg1, %c0_i32_1 : i32
    %4 = arith.extui %3 : i1 to i32
    %c0_i32_2 = arith.constant 0 : i32
    %5 = arith.cmpi ne, %4, %c0_i32_2 : i32
    scf.if %5 {
      %c0 = arith.constant 0 : index
      %c0_5 = arith.constant 0 : index
      %9 = vector.load %arg6[%c0, %c0_5] : memref<2x32xf32, #tpu.memory_space<vmem>>, vector<2x32xf32>
      %c0_6 = arith.constant 0 : index
      %c0_7 = arith.constant 0 : index
      %c0_8 = arith.constant 0 : index
      %10 = vector.load %arg2[%c0_6, %c0_7, %c0_8] : memref<2x32x256xf32, #tpu.memory_space<vmem>>, vector<2x32x256xf32>
      %cst = arith.constant dense<0.000000e+00> : vector<2x32xf32>
      %11 = vector.multi_reduction <add>, %10, %cst [2] : vector<2x32x256xf32> to vector<2x32xf32>
      %12 = arith.addf %9, %11 : vector<2x32xf32>
      %c0_9 = arith.constant 0 : index
      %c0_10 = arith.constant 0 : index
      %13 = vector.load %arg6[%c0_9, %c0_10] : memref<2x32xf32, #tpu.memory_space<vmem>>, vector<2x32xf32>
      tpu.vector_store %arg6[%c0_9, %c0_10], %12 {strides = array<i32>} : memref<2x32xf32, #tpu.memory_space<vmem>>, vector<2x32xf32>,
    } else {
    }
    %c0_i32_3 = arith.constant 0 : i32
    %6 = arith.cmpi eq, %arg1, %c0_i32_3 : i32
    %7 = arith.extui %6 : i1 to i32
    %c0_i32_4 = arith.constant 0 : i32
    %8 = arith.cmpi ne, %7, %c0_i32_4 : i32
    scf.if %8 {
      %c0 = arith.constant 0 : index
      %c0_5 = arith.constant 0 : index
      %c0_6 = arith.constant 0 : index
      %9 = vector.load %arg2[%c0, %c0_5, %c0_6] : memref<2x32x256xf32, #tpu.memory_space<vmem>>, vector<2x32x256xf32>
      %c0_7 = arith.constant 0 : index
      %c0_8 = arith.constant 0 : index
      %10 = vector.load %arg6[%c0_7, %c0_8] : memref<2x32xf32, #tpu.memory_space<vmem>>, vector<2x32xf32>
      %cst = arith.constant dense<0.000000e+00> : vector<2x32xf32>
      %11 = vector.multi_reduction <add>, %9, %cst [2] : vector<2x32x256xf32> to vector<2x32xf32>
      %12 = arith.addf %10, %11 : vector<2x32xf32>
      %c0_9 = arith.constant 0 : index
      %c0_10 = arith.constant 0 : index
      %13 = vector.load %arg3[%c0_9, %c0_10] : memref<32x128xf32, #tpu.memory_space<vmem>>, vector<32x128xf32>
      %cst_11 = arith.constant dense<0.000000e+00> : vector<2x128xf32>
      %14 = tpu.matmul %12, %13, %cst_11 {dimension_numbers = #tpu.dot_dimension_numbers<[1], [0], [0], [1], [0, 0, 1, 1], [], []>} : vector<2x32xf32>, vector<32x128xf32>, vector<2x128xf32> -> vector<2x128xf32>
      %c0_12 = arith.constant 0 : index
      %c0_13 = arith.constant 0 : index
      %15 = vector.load %arg4[%c0_12, %c0_13] : memref<1x128xf32, #tpu.memory_space<vmem>>, vector<1x128xf32>
      %16 = vector.broadcast %15 : vector<1x128xf32> to vector<2x128xf32>
      %17 = arith.addf %14, %16 : vector<2x128xf32>
      %c0_14 = arith.constant 0 : index
      %c0_15 = arith.constant 0 : index
      %18 = vector.load %arg5[%c0_14, %c0_15] : memref<2x128xf32, #tpu.memory_space<vmem>>, vector<2x128xf32>
      tpu.vector_store %arg5[%c0_14, %c0_15], %17 {strides = array<i32>} : memref<2x128xf32, #tpu.memory_space<vmem>>, vector<2x128xf32>,
    } else {
    }
    return
  }
  func.func @transform_0(%arg0: i32, %arg1: i32) -> (i32, i32, i32) {
    %c0_i32 = arith.constant 0 : i32
    %c0_i32_0 = arith.constant 0 : i32
    return %arg0, %c0_i32, %arg1 : i32, i32, i32
  }
  func.func @transform_1(%arg0: i32, %arg1: i32) -> (i32, i32) {
    %c0_i32 = arith.constant 0 : i32
    %c0_i32_0 = arith.constant 0 : i32
    %c0_i32_1 = arith.constant 0 : i32
    return %c0_i32, %c0_i32_0 : i32, i32
  }
  func.func @transform_2(%arg0: i32, %arg1: i32) -> (i32, i32) {
    %c0_i32 = arith.constant 0 : i32
    %c0_i32_0 = arith.constant 0 : i32
    %c0_i32_1 = arith.constant 0 : i32
    return %c0_i32, %c0_i32_0 : i32, i32
  }
  func.func @transform_3(%arg0: i32, %arg1: i32) -> (i32, i32) {
    %c0_i32 = arith.constant 0 : i32
    %c0_i32_0 = arith.constant 0 : i32
    return %arg0, %c0_i32 : i32, i32
  }
}

</mosaic_0001>

<bundles_post_ra>
// kernel: tpu_custom_call.1
= control target key start
LH: loop header
LB: loop body
LE: loop exit
PB: predicated region body
PF: predicated region fallthrough
CT: control target
= control target key end

     0   :  { %8 = vsyncpa [#allocation4], 0  ;;  %s391_s0 = inlined_call_operand.hbm [shape: f32[2,32,256], index: 0, kind: input, shape index: {}]   ;;  %s392_s1 = inlined_call_operand.hbm [shape: f32[32,128], index: 1, kind: input, shape index: {}]   ;;  %s393_s2 = inlined_call_operand.vmem [shape: f32[1,128], index: 2, kind: input, shape index: {}]   ;;  %s394_s3 = inlined_call_operand.hbm [shape: f32[2,128], index: 3, kind: output, shape index: {}]  }
   0x1   :  { %9 = vsyncpa [#allocation7], 0 }
   0x2   :  { %10 = vsyncpa [#allocation5], 0  ;;  %s15_s14 = sshll.u32 %s391_s0, 4  ;;  %s351_s15 = smov [#allocation3]   ;;  %s16_s14 = int_to_ptr.hbm [resolvable:$true] %s15_s14 }
   0x3   :  { %s17_s16 = sshll.u32 %s351_s15, 4  ;;  %s28_s19 = sshll.u32 %s392_s1, 4  ;;  %s18_s16 = int_to_ptr.vmem [resolvable:$true] %s17_s16  ;;  %s29_s19 = int_to_ptr.hbm [resolvable:$true] %s28_s19 }
   0x4   :  { %s352_s20 = smov 256   ;;  %s353_s21 = smov 16  }
   0x5   :  { %23 = dma.hbm_to_vmem [thread:$0]  %s16_s14, 2048, %s18_s16, [#allocation4], %s352_s20, %s352_s20, %s353_s21  }
   0x6   :  { %s354_s22 = smov [#allocation6]   ;;  %s355_s24 = smov 128  }
   0x7   :  { %s30_s23 = sshll.u32 %s354_s22, 4  ;;  %s356_s25 = smov 8   ;;  %s31_s23 = int_to_ptr.vmem [resolvable:$true] %s30_s23 }
   0x8   :  { %36 = dma.hbm_to_vmem [thread:$0]  %s29_s19, 512, %s31_s23, [#allocation7], %s355_s24, %s355_s24, %s356_s25  }
   0x9   :  { %345 = dma.done.wait [#allocation4], 2048  }
   0xa   :  { %346 = vsyncadd [#allocation4], 4294965248 }
   0xb   :  { %347 = dma.done.wait [#allocation7], 512  }
   0xc   :  { %348 = vsyncadd [#allocation7], 4294966784  ;;  %v145_v0 = vld [vmem:[#allocation3 + $0x40] sm:$0xff]  ;;  %v146_v1 = vld [vmem:[#allocation3 + $0x48] sm:$0xff]  ;;  %vm51_vm0 = vcmask 254976   ;;  %v357_v25 = vmov 0.0   ;;  %v186_v30 = vlaneseq }
   0xd   :  { %v137_v2 = vld [vmem:[#allocation3] sm:$0xff]  ;;  %v166_v3 = vadd.f32 %v146_v1, %v145_v0  ;;  %v138_v4 = vld [vmem:[#allocation3 + $0x8] sm:$0xff]  ;;  %v147_v9 = vld [vmem:[#allocation3 + $0x50] sm:$0xff]  ;;  %52 = vst.msk [vmem:[#allocation2] sm:$0x3] %vm51_vm0, %v357_v25  ;;  %vm191_vm1 = vcmask 130112  }
   0xe   :  { %v141_v5 = vld [vmem:[#allocation3 + $0x20] sm:$0xff]  ;;  %v142_v6 = vld [vmem:[#allocation3 + $0x28] sm:$0xff]  ;;  %v154_v7 = vadd.f32 %v138_v4, %v137_v2  ;;  %v148_v10 = vld [vmem:[#allocation3 + $0x58] sm:$0xff]  ;;  %v187_v33 = vand.u32 127, %v186_v30  ;;  %vm195_vm2 = vcmask 195712   ;;  %vm199_vm3 = vcmask 261312  }
   0xf   :  { %v160_v8 = vadd.f32 %v142_v6, %v141_v5  ;;  %167 = vadd.xlane.f32.xlu1 %v166_v3  ;;  %v139_v11 = vld [vmem:[#allocation3 + $0x10] sm:$0xff]  ;;  %v140_v12 = vld [vmem:[#allocation3 + $0x18] sm:$0xff]  ;;  %v149_v13 = vld [vmem:[#allocation3 + $0x60] sm:$0xff]  ;;  %v169_v15 = vadd.f32 %v148_v10, %v147_v9  ;;  %vm208_vm4 = vcmask 1041409   ;;  %vm220_vm5 = vcmask 261120   ;;  %s358_s26 = smov [#allocation8]  }
  0x10   :  { %155 = vadd.xlane.f32.xlu0 %v154_v7  ;;  %v150_v14 = vld [vmem:[#allocation3 + $0x68] sm:$0xff]  ;;  %v157_v16 = vadd.f32 %v140_v12, %v139_v11  ;;  %v151_v18 = vld [vmem:[#allocation3 + $0x70] sm:$0xff]  ;;  %v152_v19 = vld [vmem:[#allocation3 + $0x78] sm:$0xff]  ;;  %v189_v34 = vadd.s32 4294967288, %v187_v33  ;;  %v193_v39 = vadd.s32 4294967280, %v187_v33  ;;  %v197_v42 = vadd.s32 4294967272, %v187_v33 }
  0x11   :  { %161 = vadd.xlane.f32.xlu2 %v160_v8  ;;  %v172_v17 = vadd.f32 %v150_v14, %v149_v13  ;;  %v143_v20 = vld [vmem:[#allocation3 + $0x30] sm:$0xff]  ;;  %v144_v21 = vld [vmem:[#allocation3 + $0x38] sm:$0xff]  ;;  %v175_v22 = vadd.f32 %v152_v19, %v151_v18  ;;  %v213_v27 = vld [vmem:[#allocation6 + $0x8] sm:$0xff]  ;;  %s250_s27 = sshll.u32 %s358_s26, 4  ;;  %s252_s30 = sshll.u32 %s394_s3, 4  ;;  %s251_s27 = int_to_ptr.vmem [resolvable:$true] %s250_s27  ;;  %s253_s30 = int_to_ptr.hbm [resolvable:$true] %s252_s30 }
  0x12   :  { %v163_v23 = vadd.f32 %v144_v21, %v143_v20  ;;  %v215_v24 = vld [vmem:[#allocation6 + $0x18] sm:$0xff]  ;;  %v214_v26 = vld [vmem:[#allocation6 + $0x10] sm:$0xff]  ;;  %v212_v28 = vld [vmem:[#allocation6] sm:$0xff] }
  0x13   :  { %236 = vmatpush.msra.mxu0 %v215_v24  ;;  %v272_v59 = vld [vmem:[%s393_s2] ss:$0 sm:$0xff] }
  0x14   :  { %v153_v55 = vld [vmem:[#allocation2] sm:$0x3] }
  0x15   :  { %237 = vmatpush.msra.mxu0 %v214_v26 }
  0x17   :  { %170 = vadd.xlane.f32.xlu1 %v169_v15  ;;  %238 = vmatpush.msra.mxu0 %v213_v27 }
  0x18   :  { %158 = vadd.xlane.f32.xlu0 %v157_v16 }
  0x19   :  { %173 = vadd.xlane.f32.xlu2 %v172_v17  ;;  %239 = vmatpush.msra.mxu0 %v212_v28 }
  0x1f   :  { %176 = vadd.xlane.f32.xlu1 %v175_v22 }
  0x20   :  { %164 = vadd.xlane.f32.xlu0 %v163_v23 }
  0x82   :  { %v168_v29 = vpop.xlane.xlu1 %167 }
  0x83   :  { %v156_v31 = vpop.xlane.xlu0 %155  ;;  %v201_v41 = vperm.slane %v168_v29, %v187_v33 }
  0x84   :  { %v162_v32 = vpop.xlane.xlu2 %161  ;;  %v188_v43 = vperm.slane %v156_v31, %v187_v33 }
  0x85   :  { %v194_v48 = vperm.slane %v162_v32, %v193_v39 }
  0x8a   :  { %v171_v35 = vpop.xlane.xlu1 %170 }
  0x8b   :  { %v159_v36 = vpop.xlane.xlu0 %158  ;;  %v202_v37 = vperm.slane %v171_v35, %v189_v34 }
  0x8c   :  { %v174_v38 = vpop.xlane.xlu2 %173  ;;  %v190_v40 = vperm.slane %v159_v36, %v189_v34 }
  0x8d   :  { %v204_v44 = vperm.slane %v174_v38, %v193_v39  ;;  %v203_v45 = vsel %vm191_vm1, %v202_v37, %v201_v41 }
  0x8e   :  { %v192_v46 = vsel %vm191_vm1, %v190_v40, %v188_v43 }
  0x8f   :  { %v205_v51 = vsel %vm195_vm2, %v204_v44, %v203_v45  ;;  %v196_v54 = vsel %vm195_vm2, %v194_v48, %v192_v46 }
  0x92   :  { %v177_v47 = vpop.xlane.xlu1 %176 }
  0x93   :  { %v206_v49 = vperm.slane %v177_v47, %v197_v42  ;;  %v165_v50 = vpop.xlane.xlu0 %164 }
  0x94   :  { %v198_v52 = vperm.slane %v165_v50, %v197_v42 }
  0x95   :  { %v207_v53 = vsel %vm199_vm3, %v206_v49, %v205_v51 }
  0x96   :  { %v200_v56 = vsel %vm199_vm3, %v198_v52, %v196_v54 }
  0x97   :  { %v209_v57 = vsel %vm208_vm4, %v207_v53, %v200_v56 }
  0x98   :  { %v211_v58 = vadd.f32 %v209_v57, %v153_v55 }
  0x9a   :  { %263 = vmatmul.msk.f32.vlgmr.msra.gmra.mxu0 %vm220_vm5, %v211_v58 }
 0x117   :  { %v241_v60 = vpop.f32.mrf.mxu0 }
 0x118   :  { %v242_v61 = vadd.f32 %v272_v59, %v241_v60 }
 0x11a   :  { %244 = vst [vmem:[#allocation8] sm:$0x3] %v242_v61 }
 0x11b   :  { %255 = dma.vmem_to_hbm [thread:$0]  %s251_s27, 32, %s253_s30, [#allocation5]  }
 0x11c   :  { %349 = dma.done.wait [#allocation5], 32  }
 0x11d   :  { %350 = vsyncadd [#allocation5], 4294967264 }
 0x11e   :  { %260 = vsyncpa [#allocation4], 1 }
 0x11f   :  { %261 = vsyncpa [#allocation7], 1 }
 0x120   :  { %262 = vsyncpa [#allocation5], 1 }

</bundles_post_ra>
